<compile_context>
chip_gen: v7x
topology: tpu7x:2x2x1
jax: 0.10.0
libtpu: 0.0.40
codegen_flags: <defaults>
</compile_context>

<pallas_src>
import functools
import math

import jax
import jax.numpy as jnp
from jax import lax
from jax.experimental import pallas as pl
from jax.experimental.pallas import tpu as pltpu


def _round_up(n, m):
    return ((n + m - 1) // m) * m


_MIN_TB = 128    # keeps every block dimension (8,128)-aligned / lane-dense
_MAX_TB = 4096


def _two_tensorcore_chip():
    """True on chips where the 'parallel' grid axis shards across 2 TensorCores."""
    try:
        kind = jax.devices()[0].device_kind.lower().replace(" ", "")
    except Exception:
        return False
    return any(tag in kind for tag in ("v4", "v5p", "v7", "tpu7"))


# ---------------------------------------------------------------------------
# Kernel
# ---------------------------------------------------------------------------
def _value_net_kernel(
    x_ref,
    w1_ref, c1_ref,
    w2_ref, c2_ref,
    w3_ref, c3_ref,
    w4_ref, b4_ref,
    o_ref,
):
    """Fused forward pass for one (tb, input) tile of the batch; writes a (1, tb) row."""
    x = x_ref[...].astype(jnp.bfloat16)

    # fc1 (+ folded bn1) + relu                       -> (tb, H)
    h = jnp.dot(x, w1_ref[...], preferred_element_type=jnp.float32) + c1_ref[...]
    h = jnp.maximum(h, 0.0)
    # dropout (eval mode): identity

    # fc2 (+ folded bn2) + relu                       -> (tb, H)
    h = jnp.dot(h.astype(jnp.bfloat16), w2_ref[...],
                preferred_element_type=jnp.float32) + c2_ref[...]
    h = jnp.maximum(h, 0.0)

    # fc3 (+ folded bn3) + relu, feature-major (NT):  (H2, H) x (tb, H)^T -> (H2, tb)
    # Batch lands on lanes so the final output row is lane-dense.
    a3 = lax.dot_general(
        w3_ref[...], h.astype(jnp.bfloat16),
        dimension_numbers=(((1,), (1,)), ((), ())),
        preferred_element_type=jnp.float32,
    ) + c3_ref[...]
    a3 = jnp.maximum(a3, 0.0)

    # fc4 + tanh: VPU multiply + sublane reduction -> dense (1, tb) row.
    v = jnp.sum(a3 * w4_ref[...], axis=0, keepdims=True) + b4_ref[0]
    o_ref[...] = jnp.tanh(v)


# ---------------------------------------------------------------------------
# Parameter init (matches PyTorch ValueNetwork defaults) and BN folding
# ---------------------------------------------------------------------------
def _xavier_uniform(key, fan_out, fan_in):
    bound = math.sqrt(6.0 / (fan_in + fan_out))
    return jax.random.uniform(key, (fan_out, fan_in), jnp.float32, -bound, bound)


def init_value_network_params(key, input_size=20, hidden_size=128):
    """Raw parameters in PyTorch layout: Linear weight (out, in), bias (out,), BN defaults."""
    ks = jax.random.split(key, 4)
    h2 = hidden_size // 2
    raw = {
        "w1": _xavier_uniform(ks[0], hidden_size, input_size), "b1": jnp.zeros((hidden_size,), jnp.float32),
        "w2": _xavier_uniform(ks[1], hidden_size, hidden_size), "b2": jnp.zeros((hidden_size,), jnp.float32),
        "w3": _xavier_uniform(ks[2], h2, hidden_size), "b3": jnp.zeros((h2,), jnp.float32),
        "w4": _xavier_uniform(ks[3], 1, h2), "b4": jnp.zeros((1,), jnp.float32),
    }
    for name, dim in (("bn1", hidden_size), ("bn2", hidden_size), ("bn3", h2)):
        raw[name + "_gamma"] = jnp.ones((dim,), jnp.float32)
        raw[name + "_beta"] = jnp.zeros((dim,), jnp.float32)
        raw[name + "_mean"] = jnp.zeros((dim,), jnp.float32)
        raw[name + "_var"] = jnp.ones((dim,), jnp.float32)
    return raw


def fold_params(raw, eps=1e-5):
    """Fold eval-mode BN into the Linear weights/biases and pack kernel operands."""
    def scale_shift(p):
        scale = raw[p + "_gamma"] / jnp.sqrt(raw[p + "_var"] + eps)   # (out,)
        shift = raw[p + "_beta"] - raw[p + "_mean"] * scale           # (out,)
        return scale, shift

    s1, t1 = scale_shift("bn1")
    s2, t2 = scale_shift("bn2")
    s3, t3 = scale_shift("bn3")

    # fc1 / fc2: batch-major layout (in, out), bias as a (1, out) row.
    w1 = (raw["w1"] * s1[:, None]).T
    c1 = (raw["b1"] * s1 + t1)[None, :]
    w2 = (raw["w2"] * s2[:, None]).T
    c2 = (raw["b2"] * s2 + t2)[None, :]

    # fc3: kept in PyTorch (out, in) layout — the kernel computes it feature-major (NT),
    # so no zero-padding of the H/2 dimension is needed.  Bias / fc4 weight are (H2, 1) columns.
    w3 = raw["w3"] * s3[:, None]                   # (H2, H)
    c3 = (raw["b3"] * s3 + t3)[:, None]            # (H2, 1)
    w4 = raw["w4"].reshape(-1, 1)                  # (H2, 1)

    return {
        "w1": w1.astype(jnp.bfloat16), "c1": c1.astype(jnp.float32),
        "w2": w2.astype(jnp.bfloat16), "c2": c2.astype(jnp.float32),
        "w3": w3.astype(jnp.bfloat16), "c3": c3.astype(jnp.float32),
        "w4": w4.astype(jnp.float32),              # VPU epilogue stays f32
        "b4": raw["b4"].astype(jnp.float32),       # scalar, lives in SMEM
    }


# ---------------------------------------------------------------------------
# Wrapper
# ---------------------------------------------------------------------------
@functools.partial(jax.jit, static_argnames=("block_batch",))
def value_network_forward(x, kp, *, block_batch=2048):
    """Fused ValueNetwork forward (eval mode). x: (batch, input_size) -> (batch, 1) f32."""
    batch, in_dim = x.shape
    hidden = kp["w1"].shape[1]
    h2 = kp["w3"].shape[0]

    # Batch tile: large (amortise per-step overhead), 128-aligned (lane-dense output blocks),
    # and on 2-TC chips capped at half the batch so both TensorCores get grid work.
    batch128 = _round_up(batch, _MIN_TB)
    tb = _round_up(min(max(int(block_batch), _MIN_TB), _MAX_TB), _MIN_TB)
    tb = min(tb, batch128)
    if _two_tensorcore_chip() and batch128 >= 2 * _MIN_TB:
        tb = min(tb, _round_up(batch128 // 2, _MIN_TB))
    padded = _round_up(batch, tb)
    grid = padded // tb

    if padded != batch:
        x = jnp.pad(x, ((0, padded - batch), (0, 0)))

    def resident(shape):
        # Weights/biases: same block every grid step -> stay resident in VMEM.
        return pl.BlockSpec(shape, lambda i: (0, 0))

    in_specs = [
        pl.BlockSpec((tb, in_dim), lambda i: (i, 0)),              # x tile
        resident(kp["w1"].shape), resident(kp["c1"].shape),
        resident(kp["w2"].shape), resident(kp["c2"].shape),
        resident(kp["w3"].shape), resident(kp["c3"].shape),
        resident(kp["w4"].shape),
        pl.BlockSpec(memory_space=pltpu.MemorySpace.SMEM),         # b4 scalar
    ]
    # Lane-dense output: one (1, tb) row per grid step of a (1, padded) array.
    out_specs = pl.BlockSpec((1, tb), lambda i: (0, i))

    flops = 2 * padded * (in_dim * hidden + hidden * hidden + hidden * h2 + h2)
    bytes_accessed = padded * (in_dim * 4 + 4) + sum(
        int(v.size) * v.dtype.itemsize for v in kp.values())
    cost = pl.CostEstimate(flops=flops, transcendentals=padded,
                           bytes_accessed=bytes_accessed)

    out = pl.pallas_call(
        _value_net_kernel,
        out_shape=jax.ShapeDtypeStruct((1, padded), jnp.float32),
        grid=(grid,),
        in_specs=in_specs,
        out_specs=out_specs,
        compiler_params=pltpu.CompilerParams(
            dimension_semantics=("parallel",),
            vmem_limit_bytes=32 * 1024 * 1024,
        ),
        cost_estimate=cost,
    )(x, kp["w1"], kp["c1"], kp["w2"], kp["c2"], kp["w3"], kp["c3"], kp["w4"], kp["b4"])

    return out[0, :batch][:, None]


# ---------------------------------------------------------------------------
# References
# ---------------------------------------------------------------------------
def _reference_forward_f32(x, raw, eps=1e-5):
    """Pure f32 JAX reference of the PyTorch eval-mode forward pass."""
    def bn(h, p):
        scale = raw[p + "_gamma"] / jnp.sqrt(raw[p + "_var"] + eps)
        return (h - raw[p + "_mean"]) * scale + raw[p + "_beta"]
    h = jnp.maximum(bn(x @ raw["w1"].T + raw["b1"], "bn1"), 0.0)
    h = jnp.maximum(bn(h @ raw["w2"].T + raw["b2"], "bn2"), 0.0)
    h = jnp.maximum(bn(h @ raw["w3"].T + raw["b3"], "bn3"), 0.0)
    return jnp.tanh(h @ raw["w4"].T + raw["b4"])


def _reference_forward_bf16(x, kp):
    """Reference that mirrors the kernel's bf16-matmul / f32-accumulate math."""
    h = jnp.dot(x.astype(jnp.bfloat16), kp["w1"], preferred_element_type=jnp.float32) + kp["c1"]
    h = jnp.maximum(h, 0.0)
    h = jnp.dot(h.astype(jnp.bfloat16), kp["w2"], preferred_element_type=jnp.float32) + kp["c2"]
    h = jnp.maximum(h, 0.0)
    a3 = lax.dot_general(kp["w3"], h.astype(jnp.bfloat16),
                         dimension_numbers=(((1,), (1,)), ((), ())),
                         preferred_element_type=jnp.float32) + kp["c3"]
    a3 = jnp.maximum(a3, 0.0)
    v = jnp.sum(a3 * kp["w4"], axis=0, keepdims=True) + kp["b4"][0]
    return jnp.tanh(v).reshape(-1, 1)


if __name__ == "__main__":
    key = jax.random.PRNGKey(0)
    pkey, xkey1, xkey2 = jax.random.split(key, 3)

    input_size, hidden_size = 20, 128
    raw = init_value_network_params(pkey, input_size, hidden_size)
    kp = fold_params(raw)

    # Small batch (single grid step, default tile).
    x_small = jax.random.normal(xkey1, (8, input_size), jnp.float32)
    out_small = jax.block_until_ready(value_network_forward(x_small, kp))
    assert out_small.shape == (8, 1), out_small.shape
    assert jnp.allclose(out_small, _reference_forward_bf16(x_small, kp), atol=1e-4, rtol=1e-4)
    assert jnp.allclose(out_small, _reference_forward_f32(x_small, raw), atol=5e-2, rtol=5e-2)

    # Larger / ragged batch exercising the batch grid, padding and the parallel axis.
    x_big = jax.random.normal(xkey2, (260, input_size), jnp.float32)
    out_big = jax.block_until_ready(value_network_forward(x_big, kp, block_batch=128))
    assert out_big.shape == (260, 1), out_big.shape
    assert jnp.allclose(out_big, _reference_forward_bf16(x_big, kp), atol=1e-4, rtol=1e-4)
    assert jnp.allclose(out_big, _reference_forward_f32(x_big, raw), atol=5e-2, rtol=5e-2)

    print("KERNEL_OK")
</pallas_src>

<mosaic_0001>
module attributes {stable_mosaic.version = 11 : i64} {
  func.func @_value_net_kernel(%arg0: i32, %arg1: memref<128x20xf32, #tpu.memory_space<vmem>>, %arg2: memref<20x128xbf16, #tpu.memory_space<vmem>>, %arg3: memref<1x128xf32, #tpu.memory_space<vmem>>, %arg4: memref<128x128xbf16, #tpu.memory_space<vmem>>, %arg5: memref<1x128xf32, #tpu.memory_space<vmem>>, %arg6: memref<64x128xbf16, #tpu.memory_space<vmem>>, %arg7: memref<64x1xf32, #tpu.memory_space<vmem>>, %arg8: memref<64x1xf32, #tpu.memory_space<vmem>>, %arg9: memref<1xf32, #tpu.memory_space<smem>>, %arg10: memref<1x128xf32, #tpu.memory_space<vmem>>) attributes {dimension_semantics = [#tpu.dimension_semantics<parallel>], iteration_bounds = array<i64: 1>, scalar_prefetch = 0 : i64, scratch_operands = 0 : i64, tpu.core_type = #tpu.core_type<tc>, window_params = [{transform_indices = @transform_0, window_bounds = array<i64: 128, 20>}, {pipeline_mode = #tpu.pipeline_mode<synchronous>, transform_indices = @transform_1, window_bounds = array<i64: 20, 128>}, {pipeline_mode = #tpu.pipeline_mode<synchronous>, transform_indices = @transform_2, window_bounds = array<i64: 1, 128>}, {pipeline_mode = #tpu.pipeline_mode<synchronous>, transform_indices = @transform_3, window_bounds = array<i64: 128, 128>}, {pipeline_mode = #tpu.pipeline_mode<synchronous>, transform_indices = @transform_4, window_bounds = array<i64: 1, 128>}, {pipeline_mode = #tpu.pipeline_mode<synchronous>, transform_indices = @transform_5, window_bounds = array<i64: 64, 128>}, {pipeline_mode = #tpu.pipeline_mode<synchronous>, transform_indices = @transform_6, window_bounds = array<i64: 64, 1>}, {pipeline_mode = #tpu.pipeline_mode<synchronous>, transform_indices = @transform_7, window_bounds = array<i64: 64, 1>}, {transform_indices = @transform_8, window_bounds = array<i64: 1>}, {transform_indices = @transform_9, window_bounds = array<i64: 1, 128>}]} {
    %c0 = arith.constant 0 : index
    %c0_0 = arith.constant 0 : index
    %0 = vector.load %arg1[%c0, %c0_0] : memref<128x20xf32, #tpu.memory_space<vmem>>, vector<128x20xf32>
    %1 = arith.truncf %0 : vector<128x20xf32> to vector<128x20xbf16>
    %c0_1 = arith.constant 0 : index
    %c0_2 = arith.constant 0 : index
    %2 = vector.load %arg2[%c0_1, %c0_2] : memref<20x128xbf16, #tpu.memory_space<vmem>>, vector<20x128xbf16>
    %cst = arith.constant dense<0.000000e+00> : vector<128x128xf32>
    %3 = tpu.matmul %1, %2, %cst {dimension_numbers = #tpu.dot_dimension_numbers<[1], [0], [0], [1], [0, 0, 1, 1], [], []>} : vector<128x20xbf16>, vector<20x128xbf16>, vector<128x128xf32> -> vector<128x128xf32>
    %c0_3 = arith.constant 0 : index
    %c0_4 = arith.constant 0 : index
    %4 = vector.load %arg3[%c0_3, %c0_4] : memref<1x128xf32, #tpu.memory_space<vmem>>, vector<1x128xf32>
    %5 = vector.broadcast %4 : vector<1x128xf32> to vector<128x128xf32>
    %6 = arith.addf %3, %5 : vector<128x128xf32>
    %cst_5 = arith.constant 0.000000e+00 : f32
    %7 = vector.broadcast %cst_5 : f32 to vector<128x128xf32>
    %8 = arith.maximumf %6, %7 : vector<128x128xf32>
    %9 = arith.truncf %8 : vector<128x128xf32> to vector<128x128xbf16>
    %c0_6 = arith.constant 0 : index
    %c0_7 = arith.constant 0 : index
    %10 = vector.load %arg4[%c0_6, %c0_7] : memref<128x128xbf16, #tpu.memory_space<vmem>>, vector<128x128xbf16>
    %cst_8 = arith.constant dense<0.000000e+00> : vector<128x128xf32>
    %11 = tpu.matmul %9, %10, %cst_8 {dimension_numbers = #tpu.dot_dimension_numbers<[1], [0], [0], [1], [0, 0, 1, 1], [], []>} : vector<128x128xbf16>, vector<128x128xbf16>, vector<128x128xf32> -> vector<128x128xf32>
    %c0_9 = arith.constant 0 : index
    %c0_10 = arith.constant 0 : index
    %12 = vector.load %arg5[%c0_9, %c0_10] : memref<1x128xf32, #tpu.memory_space<vmem>>, vector<1x128xf32>
    %13 = vector.broadcast %12 : vector<1x128xf32> to vector<128x128xf32>
    %14 = arith.addf %11, %13 : vector<128x128xf32>
    %cst_11 = arith.constant 0.000000e+00 : f32
    %15 = vector.broadcast %cst_11 : f32 to vector<128x128xf32>
    %16 = arith.maximumf %14, %15 : vector<128x128xf32>
    %c0_12 = arith.constant 0 : index
    %c0_13 = arith.constant 0 : index
    %17 = vector.load %arg6[%c0_12, %c0_13] : memref<64x128xbf16, #tpu.memory_space<vmem>>, vector<64x128xbf16>
    %18 = arith.truncf %16 : vector<128x128xf32> to vector<128x128xbf16>
    %cst_14 = arith.constant dense<0.000000e+00> : vector<64x128xf32>
    %19 = tpu.matmul %17, %18, %cst_14 {dimension_numbers = #tpu.dot_dimension_numbers<[1], [1], [0], [0], [0, 0, 1, 0], [], []>} : vector<64x128xbf16>, vector<128x128xbf16>, vector<64x128xf32> -> vector<64x128xf32>
    %c0_15 = arith.constant 0 : index
    %c0_16 = arith.constant 0 : index
    %20 = vector.load %arg7[%c0_15, %c0_16] : memref<64x1xf32, #tpu.memory_space<vmem>>, vector<64x1xf32>
    %21 = vector.broadcast %20 : vector<64x1xf32> to vector<64x128xf32>
    %22 = arith.addf %19, %21 : vector<64x128xf32>
    %cst_17 = arith.constant 0.000000e+00 : f32
    %23 = vector.broadcast %cst_17 : f32 to vector<64x128xf32>
    %24 = arith.maximumf %22, %23 : vector<64x128xf32>
    %c0_18 = arith.constant 0 : index
    %c0_19 = arith.constant 0 : index
    %25 = vector.load %arg8[%c0_18, %c0_19] : memref<64x1xf32, #tpu.memory_space<vmem>>, vector<64x1xf32>
    %26 = vector.broadcast %25 : vector<64x1xf32> to vector<64x128xf32>
    %27 = arith.mulf %24, %26 : vector<64x128xf32>
    %cst_20 = arith.constant dense<0.000000e+00> : vector<128xf32>
    %28 = vector.multi_reduction <add>, %27, %cst_20 [0] : vector<64x128xf32> to vector<128xf32>
    %29 = vector.shape_cast %28 : vector<128xf32> to vector<1x128xf32>
    %c0_21 = arith.constant 0 : index
    %30 = memref.load %arg9[%c0_21] : memref<1xf32, #tpu.memory_space<smem>>
    %31 = vector.broadcast %30 : f32 to vector<1x128xf32>
    %32 = arith.addf %29, %31 : vector<1x128xf32>
    %33 = math.tanh %32 : vector<1x128xf32>
    %c0_22 = arith.constant 0 : index
    %c0_23 = arith.constant 0 : index
    %34 = vector.load %arg10[%c0_22, %c0_23] : memref<1x128xf32, #tpu.memory_space<vmem>>, vector<1x128xf32>
    tpu.vector_store %arg10[%c0_22, %c0_23], %33 {strides = array<i32>} : memref<1x128xf32, #tpu.memory_space<vmem>>, vector<1x128xf32>,
    return
  }
  func.func @transform_0(%arg0: i32) -> (i32, i32) {
    %c0_i32 = arith.constant 0 : i32
    %c0_i32_0 = arith.constant 0 : i32
    return %arg0, %c0_i32 : i32, i32
  }
  func.func @transform_1(%arg0: i32) -> (i32, i32) {
    %c0_i32 = arith.constant 0 : i32
    %c0_i32_0 = arith.constant 0 : i32
    %c0_i32_1 = arith.constant 0 : i32
    return %c0_i32, %c0_i32_0 : i32, i32
  }
  func.func @transform_2(%arg0: i32) -> (i32, i32) {
    %c0_i32 = arith.constant 0 : i32
    %c0_i32_0 = arith.constant 0 : i32
    %c0_i32_1 = arith.constant 0 : i32
    return %c0_i32, %c0_i32_0 : i32, i32
  }
  func.func @transform_3(%arg0: i32) -> (i32, i32) {
    %c0_i32 = arith.constant 0 : i32
    %c0_i32_0 = arith.constant 0 : i32
    %c0_i32_1 = arith.constant 0 : i32
    return %c0_i32, %c0_i32_0 : i32, i32
  }
  func.func @transform_4(%arg0: i32) -> (i32, i32) {
    %c0_i32 = arith.constant 0 : i32
    %c0_i32_0 = arith.constant 0 : i32
    %c0_i32_1 = arith.constant 0 : i32
    return %c0_i32, %c0_i32_0 : i32, i32
  }
  func.func @transform_5(%arg0: i32) -> (i32, i32) {
    %c0_i32 = arith.constant 0 : i32
    %c0_i32_0 = arith.constant 0 : i32
    %c0_i32_1 = arith.constant 0 : i32
    return %c0_i32, %c0_i32_0 : i32, i32
  }
  func.func @transform_6(%arg0: i32) -> (i32, i32) {
    %c0_i32 = arith.constant 0 : i32
    %c0_i32_0 = arith.constant 0 : i32
    %c0_i32_1 = arith.constant 0 : i32
    return %c0_i32, %c0_i32_0 : i32, i32
  }
  func.func @transform_7(%arg0: i32) -> (i32, i32) {
    %c0_i32 = arith.constant 0 : i32
    %c0_i32_0 = arith.constant 0 : i32
    %c0_i32_1 = arith.constant 0 : i32
    return %c0_i32, %c0_i32_0 : i32, i32
  }
  func.func @transform_8(%arg0: i32) -> i32 {
    %c0_i32 = arith.constant 0 : i32
    %c0_i32_0 = arith.constant 0 : i32
    return %c0_i32 : i32
  }
  func.func @transform_9(%arg0: i32) -> (i32, i32) {
    %c0_i32 = arith.constant 0 : i32
    %c0_i32_0 = arith.constant 0 : i32
    return %c0_i32, %arg0 : i32, i32
  }
}

</mosaic_0001>

<bundles_post_ra>
// kernel: value_network_forward.1
= control target key start
LH: loop header
LB: loop body
LE: loop exit
PB: predicated region body
PF: predicated region fallthrough
CT: control target
= control target key end

     0   :  { %vm102_vm0 = vcmask 1041408   ;;  %vm77_vm1 = vcmask 162816   ;;  %s1017_s1 = inlined_call_operand.vmem [shape: bf16[20,128], index: 1, kind: input, shape index: {}]   ;;  %s1018_s0 = inlined_call_operand.vmem [shape: f32[128,20], index: 0, kind: input, shape index: {}]   ;;  %s1019_s3 = inlined_call_operand.vmem [shape: bf16[128,128], index: 3, kind: input, shape index: {}]   ;;  %s1020_s2 = inlined_call_operand.vmem [shape: f32[1,128], index: 2, kind: input, shape index: {}]   ;;  %s1021_s5 = inlined_call_operand.vmem [shape: bf16[64,128], index: 5, kind: input, shape index: {}]   ;;  %s1022_s6 = inlined_call_operand.vmem [shape: f32[64,1], index: 6, kind: input, shape index: {}]   ;;  %s1023_s7 = inlined_call_operand.vmem [shape: f32[64,1], index: 7, kind: input, shape index: {}]   ;;  %s1024_s4 = inlined_call_operand.vmem [shape: f32[1,128], index: 4, kind: input, shape index: {}]   ;;  %s1025_s8 = inlined_call_operand.<no memory space> [shape: f32[1], index: 8, kind: input, shape index: {}]   ;;  %s1026_s9 = inlined_call_operand.vmem [shape: f32[1,128], index: 9, kind: output, shape index: {}]  }
   0x1   :  { %v792_v0 = vld [vmem:[%s1017_s1] sm:$0xff]   ;;  %v793_v1 = vld [vmem:[%s1017_s1 + $0x8] ss:$0 sps:$4 sm:$0x33]   ;;  %v36_v5 = vld [vmem:[%s1018_s0 + $0x10] sm:$0xff] }
   0x2   :  { %v34_v2 = vld [vmem:[%s1018_s0] sm:$0xff]  ;;  %v35_v3 = vld [vmem:[%s1018_s0 + $0x8] sm:$0xff]  ;;  %712 = vmatprep.subr.bf16.mxu1 %v792_v0  ;;  %v37_v6 = vld [vmem:[%s1018_s0 + $0x18] sm:$0xff]  ;;  %v104_v7 = vsel %vm102_vm0, %v793_v1, 0 }
   0x3   :  { %v50_v4 = vpack.c.bf16 %v35_v3, %v34_v2  ;;  %713 = vmatpush3.bf16.msra.mxu1 %v792_v0  ;;  %v38_v8 = vld [vmem:[%s1018_s0 + $0x20] sm:$0xff]  ;;  %v39_v9 = vld [vmem:[%s1018_s0 + $0x28] sm:$0xff]  ;;  %v51_v10 = vpack.c.bf16 %v37_v6, %v36_v5  ;;  %v40_v14 = vld [vmem:[%s1018_s0 + $0x30] sm:$0xff] }
   0x4   :  { %788 = vmatprep.subr.msk.bf16.mxu1 %vm102_vm0, %v793_v1  ;;  %v794_v11 = vld [vmem:[%s1019_s3] sm:$0xff]   ;;  %v52_v12 = vpack.c.bf16 %v39_v9, %v38_v8  ;;  %v795_v13 = vld [vmem:[%s1019_s3 + $0x8] sm:$0xff]   ;;  %v41_v15 = vld [vmem:[%s1018_s0 + $0x38] sm:$0xff] }
   0x5   :  { %716 = vmatprep.mubr.msk.bf16.mxu1 %vm77_vm1, %v50_v4  ;;  %v42_v16 = vld [vmem:[%s1018_s0 + $0x40] sm:$0xff]  ;;  %v43_v17 = vld [vmem:[%s1018_s0 + $0x48] sm:$0xff]  ;;  %v796_v18 = vld [vmem:[%s1019_s3 + $0x10] sm:$0xff]   ;;  %v53_v19 = vpack.c.bf16 %v41_v15, %v40_v14 }
   0x6   :  { %v54_v20 = vpack.c.bf16 %v43_v17, %v42_v16  ;;  %v797_v21 = vld [vmem:[%s1019_s3 + $0x18] sm:$0xff]   ;;  %v44_v22 = vld [vmem:[%s1018_s0 + $0x50] sm:$0xff]  ;;  %v46_v24 = vld [vmem:[%s1018_s0 + $0x60] sm:$0xff] }
   0x7   :  { %715 = vmatpush3.bf16.msra.mxu1 %v104_v7  ;;  %v45_v23 = vld [vmem:[%s1018_s0 + $0x58] sm:$0xff]  ;;  %v47_v25 = vld [vmem:[%s1018_s0 + $0x68] sm:$0xff]  ;;  %v798_v26 = vld [vmem:[%s1019_s3 + $0x20] sm:$0xff]  }
   0x8   :  { %732 = vmatprep.subr.bf16.mxu1 %v794_v11  ;;  %v55_v27 = vpack.c.bf16 %v45_v23, %v44_v22  ;;  %v56_v28 = vpack.c.bf16 %v47_v25, %v46_v24  ;;  %v799_v29 = vld [vmem:[%s1019_s3 + $0x28] sm:$0xff]   ;;  %v48_v30 = vld [vmem:[%s1018_s0 + $0x70] sm:$0xff]  ;;  %v49_v31 = vld [vmem:[%s1018_s0 + $0x78] sm:$0xff] }
   0x9   :  { %v57_v32 = vpack.c.bf16 %v49_v31, %v48_v30  ;;  %v800_v33 = vld [vmem:[%s1019_s3 + $0x30] sm:$0xff]   ;;  %v801_v34 = vld [vmem:[%s1019_s3 + $0x38] sm:$0xff]   ;;  %v650_v35 = vld [vmem:[%s1020_s2] ss:$0 sm:$0xff] }
   0xa   :  { %717 = vmatmul.mubr.msk.bf16.vlgmr.msra.gmra.mrb[0].mxu1 %vm77_vm1, %v51_v10  ;;  %v427_v30 = vld [vmem:[%s1022_s6] sm:$0xff]  ;;  %v429_v31 = vld [vmem:[%s1022_s6 + $0x10] sm:$0xff] }
   0xb   :  { %720 = vmatprep.mubr.msk.bf16.mxu1 %vm77_vm1, %v52_v12  ;;  %733 = vmatpush3.bf16.msra.mxu1 %v794_v11 }
   0xc   :  { %734 = vmatprep.subr.bf16.mxu1 %v795_v13 }
   0xf   :  { %735 = vmatpush3.bf16.msra.mxu1 %v795_v13 }
  0x10   :  { %736 = vmatprep.subr.bf16.mxu1 %v796_v18 }
  0x12   :  { %721 = vmatmul.mubr.msk.bf16.gmra.mrb[4].mxu1 %vm77_vm1, %v53_v19 }
  0x13   :  { %724 = vmatprep.mubr.msk.bf16.mxu1 %vm77_vm1, %v54_v20  ;;  %737 = vmatpush3.bf16.msra.mxu1 %v796_v18 }
  0x14   :  { %738 = vmatprep.subr.bf16.mxu1 %v797_v21 }
  0x17   :  { %739 = vmatpush3.bf16.msra.mxu1 %v797_v21 }
  0x18   :  { %740 = vmatprep.subr.bf16.mxu1 %v798_v26 }
  0x1a   :  { %725 = vmatmul.mubr.msk.bf16.gmra.mrb[8].mxu1 %vm77_vm1, %v55_v27 }
  0x1b   :  { %728 = vmatprep.mubr.msk.bf16.mxu1 %vm77_vm1, %v56_v28  ;;  %741 = vmatpush3.bf16.msra.mxu1 %v798_v26  ;;  %v802_v28 = vld [vmem:[%s1021_s5] sm:$0xff]  }
  0x1c   :  { %742 = vmatprep.subr.bf16.mxu1 %v799_v29  ;;  %780 = vmatprep.mubr.bf16.mxu0 %v802_v28 }
  0x1f   :  { %743 = vmatpush3.bf16.msra.mxu1 %v799_v29  ;;  %v808_v29 = vmov 0  }
  0x20   :  { %744 = vmatprep.subr.bf16.mxu1 %v800_v33  ;;  %790 = vset.pattern.permute.xlu0 %v808_v29 }
  0x21   :  { %791 = vset.pattern.permute.xlu1 %v808_v29  ;;  %437 = vperm.xlu0 %790, %v427_v30  }
  0x22   :  { %729 = vmatmul.mubr.msk.bf16.gmra.mrb[12].mxu1 %vm77_vm1, %v57_v32  ;;  %447 = vperm.xlu1 %791, %v429_v31   ;;  %v428_v32 = vld [vmem:[%s1022_s6 + $0x8] sm:$0xff] }
  0x23   :  { %745 = vmatpush3.bf16.msra.mxu1 %v800_v33  ;;  %v430_v33 = vld [vmem:[%s1022_s6 + $0x18] sm:$0xff] }
  0x24   :  { %746 = vmatprep.subr.bf16.mxu1 %v801_v34 }
  0x25   :  { %442 = vperm.xlu0 %790, %v428_v32  }
  0x26   :  { %452 = vperm.xlu1 %791, %v430_v33  }
  0x27   :  { %747 = vmatpush3.bf16.msra.mxu1 %v801_v34  ;;  %v572_v34 = vld [vmem:[%s1023_s7] sm:$0xff] }
  0x29   :  { %582 = vperm.xlu0 %790, %v572_v34  }
  0xdd   :  { %v718_v36 = vpop.f32.mrb[0].mxu1 }
  0xde   :  { %v149_v37 = vadd.f32 %v718_v36, %v650_v35  ;;  %v140_v38 = vpop.f32.mrb[1].mxu1  ;;  %v431_v36 = vld [vmem:[%s1022_s6 + $0x20] sm:$0xff] }
  0xdf   :  { %v141_v39 = vadd.f32 %v650_v35, %v140_v38  ;;  %v719_v40 = vpop.f32.mrb[2].mxu1  ;;  %457 = vperm.xlu0 %790, %v431_v36   ;;  %v432_v38 = vld [vmem:[%s1022_s6 + $0x28] sm:$0xff] }
  0xe0   :  { %v152_v41 = vadd.f32 %v719_v40, %v650_v35  ;;  %v143_v42 = vpop.f32.mrb[3].mxu1  ;;  %v205_v44 = vmax.f32 %v149_v37, 0.0  ;;  %v574_v37 = vld [vmem:[%s1023_s7 + $0x10] sm:$0xff] }
  0xe1   :  { %v144_v43 = vadd.f32 %v650_v35, %v143_v42  ;;  %v203_v46 = vmax.f32 %v141_v39, 0.0  ;;  %v575_v39 = vld [vmem:[%s1023_s7 + $0x18] sm:$0xff]  ;;  %v433_v40 = vld [vmem:[%s1022_s6 + $0x30] sm:$0xff] }
  0xe2   :  { %v206_v45 = vmax.f32 %v152_v41, 0.0  ;;  %v576_v41 = vld [vmem:[%s1023_s7 + $0x20] sm:$0xff]  ;;  %v434_v42 = vld [vmem:[%s1022_s6 + $0x38] sm:$0xff] }
  0xe3   :  { %v204_v47 = vmax.f32 %v144_v43, 0.0  ;;  %462 = vperm.xlu0 %790, %v432_v38   ;;  %v577_v43 = vld [vmem:[%s1023_s7 + $0x28] sm:$0xff] }
  0xe4   :  { %v220_v48 = vpack.c.bf16 %v206_v45, %v205_v44  ;;  %v578_v44 = vld [vmem:[%s1023_s7 + $0x30] sm:$0xff]  ;;  %v579_v45 = vld [vmem:[%s1023_s7 + $0x38] sm:$0xff] }
  0xe5   :  { %v219_v49 = vpack.c.bf16 %v204_v47, %v203_v46  ;;  %v722_v50 = vpop.f32.mrb[4].mxu1  ;;  %v661_v46 = vld [vmem:[%s1024_s4] ss:$0 sm:$0xff] }
  0xe6   :  { %v165_v51 = vadd.f32 %v722_v50, %v650_v35  ;;  %v156_v52 = vpop.f32.mrb[5].mxu1 }
  0xe7   :  { %v157_v53 = vadd.f32 %v650_v35, %v156_v52  ;;  %748 = vmatprep.mubr.bf16.mxu1 %v219_v49  ;;  %v723_v54 = vpop.f32.mrb[6].mxu1  ;;  %467 = vperm.xlu0 %790, %v433_v40   ;;  %v804_v40 = vld [vmem:[%s1021_s5 + $0x10] sm:$0xff]  }
  0xe8   :  { %v209_v55 = vmax.f32 %v165_v51, 0.0  ;;  %v168_v56 = vadd.f32 %v723_v54, %v650_v35  ;;  %749 = vmatmul.mubr.bf16.vlgmr.msra.gmra.mrb[16].mxu1 %v220_v48  ;;  %v159_v57 = vpop.f32.mrb[7].mxu1 }
  0xe9   :  { %v207_v58 = vmax.f32 %v157_v53, 0.0  ;;  %v160_v59 = vadd.f32 %v650_v35, %v159_v57 }
  0xea   :  { %v210_v60 = vmax.f32 %v168_v56, 0.0 }
  0xeb   :  { %v208_v61 = vmax.f32 %v160_v59, 0.0  ;;  %472 = vperm.xlu0 %790, %v434_v42   ;;  %v438_v42 = vpop.permute.xlu0 %437 }
  0xec   :  { %v222_v62 = vpack.c.bf16 %v210_v60, %v209_v55 }
  0xed   :  { %v221_v63 = vpack.c.bf16 %v208_v61, %v207_v58  ;;  %v726_v0 = vpop.f32.mrb[8].mxu1 }
  0xee   :  { %v181_v1 = vadd.f32 %v726_v0, %v650_v35  ;;  %v172_v2 = vpop.f32.mrb[9].mxu1 }
  0xef   :  { %752 = vmatprep.mubr.bf16.mxu1 %v221_v63  ;;  %v173_v3 = vadd.f32 %v650_v35, %v172_v2  ;;  %v727_v4 = vpop.f32.mrb[10].mxu1  ;;  %612 = vperm.xlu0 %790, %v578_v44   ;;  %v443_v44 = vpop.permute.xlu0 %442 }
  0xf0   :  { %753 = vmatmul.mubr.bf16.gmra.mrb[20].mxu1 %v222_v62  ;;  %v213_v5 = vmax.f32 %v181_v1, 0.0  ;;  %v184_v6 = vadd.f32 %v727_v4, %v650_v35  ;;  %v175_v7 = vpop.f32.mrb[11].mxu1 }
  0xf1   :  { %v211_v8 = vmax.f32 %v173_v3, 0.0  ;;  %v176_v9 = vadd.f32 %v650_v35, %v175_v7 }
  0xf2   :  { %v214_v10 = vmax.f32 %v184_v6, 0.0 }
  0xf3   :  { %v212_v11 = vmax.f32 %v176_v9, 0.0 }
  0xf4   :  { %v224_v12 = vpack.c.bf16 %v214_v10, %v213_v5 }
  0xf5   :  { %v223_v13 = vpack.c.bf16 %v212_v11, %v211_v8  ;;  %v730_v14 = vpop.f32.mrb[12].mxu1 }
  0xf6   :  { %v197_v15 = vadd.f32 %v730_v14, %v650_v35  ;;  %v188_v16 = vpop.f32.mrb[13].mxu1 }
  0xf7   :  { %756 = vmatprep.mubr.bf16.mxu1 %v223_v13  ;;  %v189_v17 = vadd.f32 %v650_v35, %v188_v16  ;;  %v731_v18 = vpop.f32.mrb[14].mxu1 }
  0xf8   :  { %757 = vmatmul.mubr.bf16.gmra.mrb[24].mxu1 %v224_v12  ;;  %v217_v19 = vmax.f32 %v197_v15, 0.0  ;;  %v200_v20 = vadd.f32 %v731_v18, %v650_v35  ;;  %v191_v21 = vpop.f32.mrb[15].mxu1 }
  0xf9   :  { %v215_v22 = vmax.f32 %v189_v17, 0.0  ;;  %v192_v23 = vadd.f32 %v650_v35, %v191_v21  ;;  %v573_v35 = vld [vmem:[%s1023_s7 + $0x8] sm:$0xff] }
  0xfa   :  { %v218_v24 = vmax.f32 %v200_v20, 0.0  ;;  %587 = vperm.xlu1 %791, %v573_v35  }
  0xfb   :  { %v216_v25 = vmax.f32 %v192_v23, 0.0 }
  0xfc   :  { %v226_v26 = vpack.c.bf16 %v218_v24, %v217_v19 }
  0xfd   :  { %v225_v27 = vpack.c.bf16 %v216_v25, %v215_v22 }
  0xfe   :  { %592 = vperm.xlu1 %791, %v574_v37  }
  0xff   :  { %760 = vmatprep.mubr.bf16.mxu1 %v225_v27 }
 0x100   :  { %761 = vmatmul.mubr.bf16.gmra.mrb[28].mxu1 %v226_v26 }
 0x102   :  { %597 = vperm.xlu1 %791, %v575_v39   ;;  %v803_v39 = vld [vmem:[%s1021_s5 + $0x8] sm:$0xff]  }
 0x106   :  { %602 = vperm.xlu1 %791, %v576_v41   ;;  %v805_v41 = vld [vmem:[%s1021_s5 + $0x18] sm:$0xff]  }
 0x10a   :  { %607 = vperm.xlu1 %791, %v577_v43   ;;  %v448_v43 = vpop.permute.xlu1 %447 }
 0x10e   :  { %617 = vperm.xlu1 %791, %v579_v45   ;;  %v453_v45 = vpop.permute.xlu1 %452 }
 0x1bb   :  { %v750_v47 = vpop.f32.mrb[16].mxu1 }
 0x1bc   :  { %v341_v48 = vadd.f32 %v750_v47, %v661_v46  ;;  %v332_v49 = vpop.f32.mrb[17].mxu1  ;;  %v588_v47 = vpop.permute.xlu1 %587 }
 0x1bd   :  { %v333_v50 = vadd.f32 %v661_v46, %v332_v49  ;;  %v751_v51 = vpop.f32.mrb[18].mxu1 }
 0x1be   :  { %v344_v52 = vadd.f32 %v751_v51, %v661_v46  ;;  %v335_v53 = vpop.f32.mrb[19].mxu1  ;;  %v397_v55 = vmax.f32 %v341_v48, 0.0 }
 0x1bf   :  { %v336_v54 = vadd.f32 %v661_v46, %v335_v53  ;;  %v395_v57 = vmax.f32 %v333_v50, 0.0 }
 0x1c0   :  { %v398_v56 = vmax.f32 %v344_v52, 0.0  ;;  %v593_v49 = vpop.permute.xlu1 %592 }
 0x1c1   :  { %v396_v58 = vmax.f32 %v336_v54, 0.0 }
 0x1c2   :  { %v420_v59 = vpack.c.bf16 %v398_v56, %v397_v55 }
 0x1c3   :  { %v754_v60 = vpop.f32.mrb[20].mxu1  ;;  %v419_v61 = vpack.c.bf16 %v396_v58, %v395_v57 }
 0x1c4   :  { %v357_v62 = vadd.f32 %v754_v60, %v661_v46  ;;  %v348_v63 = vpop.f32.mrb[21].mxu1  ;;  %v598_v52 = vpop.permute.xlu1 %597 }
 0x1c5   :  { %v349_v0 = vadd.f32 %v661_v46, %v348_v63  ;;  %764 = vmatprep.subr.bf16.mxu0 %v419_v61  ;;  %v755_v1 = vpop.f32.mrb[22].mxu1 }
 0x1c6   :  { %v401_v2 = vmax.f32 %v357_v62, 0.0  ;;  %v360_v3 = vadd.f32 %v755_v1, %v661_v46  ;;  %765 = vmatpush3.bf16.xpose.msra.mxu0 %v419_v61  ;;  %v351_v4 = vpop.f32.mrb[23].mxu1 }
 0x1c7   :  { %v399_v5 = vmax.f32 %v349_v0, 0.0  ;;  %v352_v6 = vadd.f32 %v661_v46, %v351_v4  ;;  %766 = vmatprep.subr.bf16.mxu0 %v420_v59 }
 0x1c8   :  { %v402_v7 = vmax.f32 %v360_v3, 0.0  ;;  %v603_v0 = vpop.permute.xlu1 %602 }
 0x1c9   :  { %v400_v8 = vmax.f32 %v352_v6, 0.0 }
 0x1ca   :  { %v422_v9 = vpack.c.bf16 %v402_v7, %v401_v2 }
 0x1cb   :  { %v421_v10 = vpack.c.bf16 %v400_v8, %v399_v5  ;;  %v758_v11 = vpop.f32.mrb[24].mxu1 }
 0x1cc   :  { %v373_v12 = vadd.f32 %v758_v11, %v661_v46  ;;  %v364_v13 = vpop.f32.mrb[25].mxu1 }
 0x1cd   :  { %v365_v14 = vadd.f32 %v661_v46, %v364_v13  ;;  %v759_v15 = vpop.f32.mrb[26].mxu1 }
 0x1ce   :  { %767 = vmatpush3.bf16.xpose.msra.mxu0 %v420_v59  ;;  %v405_v16 = vmax.f32 %v373_v12, 0.0  ;;  %v376_v17 = vadd.f32 %v759_v15, %v661_v46  ;;  %v367_v18 = vpop.f32.mrb[27].mxu1 }
 0x1cf   :  { %768 = vmatprep.subr.bf16.mxu0 %v421_v10  ;;  %v403_v19 = vmax.f32 %v365_v14, 0.0  ;;  %v368_v20 = vadd.f32 %v661_v46, %v367_v18  ;;  %v608_v18 = vpop.permute.xlu1 %607 }
 0x1d0   :  { %v406_v21 = vmax.f32 %v376_v17, 0.0 }
 0x1d1   :  { %v404_v22 = vmax.f32 %v368_v20, 0.0 }
 0x1d2   :  { %v424_v23 = vpack.c.bf16 %v406_v21, %v405_v16 }
 0x1d3   :  { %v423_v24 = vpack.c.bf16 %v404_v22, %v403_v19  ;;  %v762_v25 = vpop.f32.mrb[28].mxu1 }
 0x1d4   :  { %v389_v26 = vadd.f32 %v762_v25, %v661_v46  ;;  %v380_v27 = vpop.f32.mrb[29].mxu1 }
 0x1d5   :  { %v381_v28 = vadd.f32 %v661_v46, %v380_v27  ;;  %v763_v29 = vpop.f32.mrb[30].mxu1 }
 0x1d6   :  { %769 = vmatpush3.bf16.xpose.msra.mxu0 %v421_v10  ;;  %v409_v30 = vmax.f32 %v389_v26, 0.0  ;;  %v392_v31 = vadd.f32 %v763_v29, %v661_v46  ;;  %v383_v32 = vpop.f32.mrb[31].mxu1  ;;  %v618_v29 = vpop.permute.xlu1 %617 }
 0x1d7   :  { %770 = vmatprep.subr.bf16.mxu0 %v422_v9  ;;  %v407_v33 = vmax.f32 %v381_v28, 0.0  ;;  %v384_v34 = vadd.f32 %v661_v46, %v383_v32  ;;  %v583_v46 = vpop.permute.xlu0 %582 }
 0x1d8   :  { %v410_v35 = vmax.f32 %v392_v31, 0.0 }
 0x1d9   :  { %v408_v36 = vmax.f32 %v384_v34, 0.0 }
 0x1da   :  { %v426_v37 = vpack.c.bf16 %v410_v35, %v409_v30 }
 0x1db   :  { %v425_v38 = vpack.c.bf16 %v408_v36, %v407_v33  ;;  %v458_v48 = vpop.permute.xlu0 %457 }
 0x1de   :  { %771 = vmatpush3.bf16.xpose.msra.mxu0 %v422_v9 }
 0x1df   :  { %772 = vmatprep.subr.bf16.mxu0 %v423_v24  ;;  %v463_v50 = vpop.permute.xlu0 %462 }
 0x1e3   :  { %v468_v61 = vpop.permute.xlu0 %467 }
 0x1e6   :  { %773 = vmatpush3.bf16.xpose.msra.mxu0 %v423_v24 }
 0x1e7   :  { %774 = vmatprep.subr.bf16.mxu0 %v424_v23  ;;  %v473_v11 = vpop.permute.xlu0 %472 }
 0x1eb   :  { %v613_v26 = vpop.permute.xlu0 %612 }
 0x1ee   :  { %775 = vmatpush3.bf16.xpose.msra.mxu0 %v424_v23 }
 0x1ef   :  { %776 = vmatprep.subr.bf16.mxu0 %v425_v38 }
 0x1f6   :  { %777 = vmatpush3.bf16.xpose.msra.mxu0 %v425_v38  ;;  %v642_v38 = vstv %s1025_s8 }
 0x1f7   :  { %778 = vmatprep.subr.bf16.mxu0 %v426_v37 }
 0x1fe   :  { %779 = vmatpush3.bf16.xpose.msra.mxu0 %v426_v37 }
 0x205   :  { %781 = vmatmul.mubr.bf16.vlgmr.msra.gmra.mrb[0].mxu0 %v803_v39 }
 0x206   :  { %784 = vmatprep.mubr.bf16.mxu0 %v804_v40 }
 0x20d   :  { %785 = vmatmul.mubr.bf16.gmra.mrb[4].mxu0 %v805_v41 }
 0x2d8   :  { %v782_v51 = vpop.f32.mrb[0].mxu0 }
 0x2d9   :  { %v533_v53 = vpop.f32.mrb[1].mxu0  ;;  %v542_v54 = vadd.f32 %v782_v51, %v448_v43 }
 0x2da   :  { %v534_v55 = vadd.f32 %v533_v53, %v438_v42  ;;  %v783_v56 = vpop.f32.mrb[2].mxu0 }
 0x2db   :  { %v545_v57 = vadd.f32 %v783_v56, %v453_v45  ;;  %v536_v58 = vpop.f32.mrb[3].mxu0  ;;  %v566_v62 = vmax.f32 %v542_v54, 0.0 }
 0x2dc   :  { %v564_v59 = vmax.f32 %v534_v55, 0.0  ;;  %v537_v60 = vadd.f32 %v536_v58, %v443_v44 }
 0x2dd   :  { %v567_v1 = vmax.f32 %v545_v57, 0.0  ;;  %v622_v6 = vmul.f32 %v593_v49, %v566_v62 }
 0x2de   :  { %v565_v63 = vmax.f32 %v537_v60, 0.0  ;;  %v620_v2 = vmul.f32 %v583_v46, %v564_v59 }
 0x2df   :  { %v623_v12 = vmul.f32 %v598_v52, %v567_v1 }
 0x2e0   :  { %v621_v3 = vmul.f32 %v588_v47, %v565_v63  ;;  %v786_v4 = vpop.f32.mrb[4].mxu0 }
 0x2e1   :  { %v549_v5 = vpop.f32.mrb[5].mxu0  ;;  %v558_v8 = vadd.f32 %v786_v4, %v468_v61 }
 0x2e2   :  { %v628_v7 = vadd.f32 %v621_v3, %v620_v2  ;;  %v550_v9 = vadd.f32 %v549_v5, %v458_v48  ;;  %v787_v10 = vpop.f32.mrb[6].mxu0 }
 0x2e3   :  { %v552_v13 = vpop.f32.mrb[7].mxu0  ;;  %v561_v16 = vadd.f32 %v787_v10, %v473_v11  ;;  %v570_v19 = vmax.f32 %v558_v8, 0.0 }
 0x2e4   :  { %v629_v14 = vadd.f32 %v628_v7, %v622_v6  ;;  %v568_v15 = vmax.f32 %v550_v9, 0.0  ;;  %v553_v17 = vadd.f32 %v552_v13, %v463_v50 }
 0x2e5   :  { %v571_v24 = vmax.f32 %v561_v16, 0.0  ;;  %v626_v27 = vmul.f32 %v613_v26, %v570_v19 }
 0x2e6   :  { %v624_v20 = vmul.f32 %v603_v0, %v568_v15  ;;  %v630_v21 = vadd.f32 %v629_v14, %v623_v12  ;;  %v569_v22 = vmax.f32 %v553_v17, 0.0 }
 0x2e7   :  { %v627_v30 = vmul.f32 %v618_v29, %v571_v24 }
 0x2e8   :  { %v631_v23 = vadd.f32 %v630_v21, %v624_v20  ;;  %v625_v25 = vmul.f32 %v608_v18, %v569_v22 }
 0x2ea   :  { %v632_v28 = vadd.f32 %v631_v23, %v625_v25 }
 0x2ec   :  { %v633_v31 = vadd.f32 %v632_v28, %v626_v27 }
 0x2ee   :  { %v634_v32 = vadd.f32 %v633_v31, %v627_v30 }
 0x2f0   :  { %v635_v33 = vrot.slane %v634_v32, 4 }
 0x2f2   :  { %v636_v34 = vadd.f32 %v635_v33, %v634_v32 }
 0x2f4   :  { %v637_v35 = vrot.slane %v636_v34, 2 }
 0x2f6   :  { %v638_v36 = vadd.f32 %v637_v35, %v636_v34 }
 0x2f8   :  { %v639_v37 = vrot.slane %v638_v36, 1 }
 0x2fa   :  { %v640_v39 = vadd.f32 %v639_v37, %v638_v36 }
 0x2fc   :  { %v643_v40 = vadd.f32 %v642_v38, %v640_v39 }
 0x2fe   :  { %806 = vtanh.f32 %v643_v40 }
 0x308   :  { %v807_v41 = vpop.eup %806 }
 0x309   :  { %645 = vst [vmem:[%s1026_s9] sm:$0x1] %v807_v41 }

</bundles_post_ra>
